<compile_context>
chip_gen: v5e
topology: v5e:2x2
jax: 0.10.0
libtpu: 0.0.40
codegen_flags: <defaults>
</compile_context>

<pallas_src>
import jax
import jax.numpy as jnp
from jax import lax
from jax.experimental import pallas as pl
from jax.experimental.pallas import tpu as pltpu

_EPS = 1e-6  # matches torch.nn.PairwiseDistance default eps


def _round_up(n, m):
    return ((n + m - 1) // m) * m


def _make_ami_kernel(c_real, folded, mm_dtype):
    """Build the kernel; c_real (unpadded class count) and layout flags are baked in."""

    def _body(rs, t_rgb, t_flow, ct_rgb, ct_flow, corr, out_ref):
        # rs: [TQ, 4] = (log w_r, log w_f, r_rgb, r_flow)
        lw_r = rs[:, 0:1]
        lw_f = rs[:, 1:2]
        r_rgb = rs[:, 2:3]
        r_flow = rs[:, 3:4]

        # Canonical [M,K]x[K,N] matmuls on the MXU (context pre-transposed in wrapper).
        cross_rgb = jnp.dot(t_rgb.astype(mm_dtype), ct_rgb.astype(mm_dtype),
                            preferred_element_type=jnp.float32)     # [TQ, Cp]
        cross_flow = jnp.dot(t_flow.astype(mm_dtype), ct_flow.astype(mm_dtype),
                             preferred_element_type=jnp.float32)    # [TQ, Cp]

        # ||t - c + eps||^2 = r_i + (||c||^2 - 2*eps*sum(c)) - 2*cross
        # (the context term is either folded into the matmul or added from `corr`).
        sq_rgb = r_rgb - 2.0 * cross_rgb
        sq_flow = r_flow - 2.0 * cross_flow
        if corr is not None:
            sq_rgb = sq_rgb + corr[0:1, :]
            sq_flow = sq_flow + corr[1:2, :]

        d_rgb = jnp.sqrt(jnp.maximum(sq_rgb, 0.0))    # clamp tiny cancellation negatives
        d_flow = jnp.sqrt(jnp.maximum(sq_flow, 0.0))

        # Weights folded into the exponent: w * exp(-d) == exp(log w - d).
        post = jnp.exp(lw_r - d_rgb) + jnp.exp(lw_f - d_flow)       # [TQ, Cp]

        # Padded class columns must not pollute the row normalization.
        col_ids = lax.broadcasted_iota(jnp.int32, post.shape, 1)
        post = jnp.where(col_ids < c_real, post, 0.0)

        # Per-row exact reciprocal, then a broadcast multiply (cheaper than a full divide).
        inv = 1.0 / jnp.sum(post, axis=-1, keepdims=True)
        out_ref[...] = (post * inv).astype(out_ref.dtype)

    if folded:
        def kernel(rs_ref, tr_ref, tf_ref, cr_ref, cf_ref, out_ref):
            _body(rs_ref[...], tr_ref[...], tf_ref[...],
                  cr_ref[...], cf_ref[...], None, out_ref)
    else:
        def kernel(corr_ref, rs_ref, tr_ref, tf_ref, cr_ref, cf_ref, out_ref):
            _body(rs_ref[...], tr_ref[...], tf_ref[...],
                  cr_ref[...], cf_ref[...], corr_ref[...], out_ref)
    return kernel


def ami_forward(x, output_AAS, *, tq_max=256, matmul_dtype=jnp.float32):
    """JAX/Pallas equivalent of AMI.forward(x, output_AAS)."""
    context_rgb = jnp.asarray(x['context_rgb_features'], jnp.float32)    # [C, D]
    context_flow = jnp.asarray(x['context_flow_features'], jnp.float32)  # [C, D]
    target_rgb = jnp.asarray(x['target_rgb_features'], jnp.float32)      # [Q, D]
    target_flow = jnp.asarray(x['target_flow_features'], jnp.float32)    # [Q, D]
    c_r = jnp.asarray(output_AAS['c_r'], jnp.float32).reshape(-1)        # [Q]
    c_f = jnp.asarray(output_AAS['c_f'], jnp.float32).reshape(-1)        # [Q]

    Q, D = target_rgb.shape
    C = context_rgb.shape[0]
    eps = _EPS

    # Padded / tiled geometry: lanes (last dims) to 128, Q (sublanes) to 8.
    D_pad = _round_up(D, 128)
    C_pad = _round_up(C, 128)
    TQ = min(tq_max, _round_up(Q, 8))
    num_q_tiles = pl.cdiv(Q, TQ)
    Q_pad = num_q_tiles * TQ
    folded = D_pad > D  # a spare padded feature column exists -> fold the context stats

    # Per-row stats + log-weights hoisted to the wrapper: [Q_pad, 4].
    denom = c_r + c_f
    lw_r = jnp.log(c_r / denom)
    lw_f = jnp.log(c_f / denom)
    eps_sq = float(D) * eps * eps
    r_rgb = (jnp.sum(target_rgb * target_rgb, axis=1)
             + (2.0 * eps) * jnp.sum(target_rgb, axis=1) + eps_sq)
    r_flow = (jnp.sum(target_flow * target_flow, axis=1)
              + (2.0 * eps) * jnp.sum(target_flow, axis=1) + eps_sq)
    rowstats = jnp.stack([lw_r, lw_f, r_rgb, r_flow], axis=1)            # [Q, 4]
    rowstats = jnp.pad(rowstats, ((0, Q_pad - Q), (0, 0)))

    def pad2(a, rows, cols):
        return jnp.pad(a, ((0, rows - a.shape[0]), (0, cols - a.shape[1])))

    t_rgb = pad2(target_rgb, Q_pad, D_pad)        # [Qp, Dp]
    t_flow = pad2(target_flow, Q_pad, D_pad)      # [Qp, Dp]

    # Per-class correction: ||c||^2 - 2*eps*sum(c).
    corr_rgb = (jnp.sum(context_rgb * context_rgb, axis=1)
                - (2.0 * eps) * jnp.sum(context_rgb, axis=1))            # [C]
    corr_flow = (jnp.sum(context_flow * context_flow, axis=1)
                 - (2.0 * eps) * jnp.sum(context_flow, axis=1))          # [C]

    # Pre-transposed contexts so the kernel matmul is [TQ, Dp] x [Dp, Cp].
    ct_rgb = pad2(context_rgb.T, D_pad, C_pad)    # [Dp, Cp]
    ct_flow = pad2(context_flow.T, D_pad, C_pad)  # [Dp, Cp]

    inputs = []
    in_specs = []
    if folded:
        # Fold corrections into the first padded feature row of the transposed context;
        # matching target column is set to 1 so the matmul picks the correction up.
        ct_rgb = ct_rgb.at[D, :C].set(-0.5 * corr_rgb)
        ct_flow = ct_flow.at[D, :C].set(-0.5 * corr_flow)
        t_rgb = t_rgb.at[:, D].set(1.0)
        t_flow = t_flow.at[:, D].set(1.0)
    else:
        corr = jnp.pad(jnp.stack([corr_rgb, corr_flow], axis=0),
                       ((0, 0), (0, C_pad - C)))                          # [2, Cp]
        inputs.append(corr)
        in_specs.append(pl.BlockSpec((2, C_pad), lambda i: (0, 0),
                                     pipeline_mode=pl.Buffered(1)))

    inputs += [rowstats, t_rgb, t_flow, ct_rgb, ct_flow]
    in_specs += [
        pl.BlockSpec((TQ, 4), lambda i: (i, 0)),                          # per-row stats
        pl.BlockSpec((TQ, D_pad), lambda i: (i, 0)),                      # target rgb tile
        pl.BlockSpec((TQ, D_pad), lambda i: (i, 0)),                      # target flow tile
        pl.BlockSpec((D_pad, C_pad), lambda i: (0, 0),
                     pipeline_mode=pl.Buffered(1)),                       # resident ctx rgb
        pl.BlockSpec((D_pad, C_pad), lambda i: (0, 0),
                     pipeline_mode=pl.Buffered(1)),                       # resident ctx flow
    ]

    itemsize = 4
    # VMEM footprint: single-buffered residents + double-buffered per-tile blocks.
    ctx_bytes = 2 * D_pad * C_pad * itemsize
    tile_bytes = 2 * (2 * TQ * D_pad + TQ * 4 + TQ * C_pad) * itemsize
    corr_bytes = 0 if folded else 2 * C_pad * itemsize
    footprint = ctx_bytes + tile_bytes + corr_bytes
    vmem_limit = min(128 << 20, max(32 << 20, int(footprint * 1.25) + (4 << 20)))

    cost = pl.CostEstimate(
        flops=2 * 2 * Q_pad * C_pad * D_pad + 8 * Q_pad * C_pad,
        transcendentals=4 * Q_pad * C_pad,            # 2x exp + 2x sqrt per output element
        bytes_accessed=itemsize * (2 * Q_pad * D_pad + 2 * D_pad * C_pad
                                   + 4 * Q_pad + 2 * C_pad + Q_pad * C_pad),
    )

    kernel = _make_ami_kernel(C, folded, matmul_dtype)

    posterior_padded = pl.pallas_call(
        kernel,
        out_shape=jax.ShapeDtypeStruct((Q_pad, C_pad), jnp.float32),
        grid=(num_q_tiles,),
        in_specs=in_specs,
        out_specs=pl.BlockSpec((TQ, C_pad), lambda i: (i, 0)),
        compiler_params=pltpu.CompilerParams(
            dimension_semantics=("parallel",),
            vmem_limit_bytes=vmem_limit),
        cost_estimate=cost,
    )(*inputs)

    return posterior_padded[:Q, :C]


def _reference(x, output_AAS):
    """Pure-JAX reference with torch.nn.PairwiseDistance semantics (eps on the diff)."""
    tr = x['target_rgb_features']
    cr = x['context_rgb_features']
    tf = x['target_flow_features']
    cf = x['context_flow_features']
    c_r = output_AAS['c_r'].reshape(-1, 1)
    c_f = output_AAS['c_f'].reshape(-1, 1)
    w_r = c_r / (c_r + c_f)
    w_f = c_f / (c_r + c_f)
    d_rgb = jnp.sqrt(jnp.sum((tr[:, None, :] - cr[None, :, :] + _EPS) ** 2, axis=-1))
    d_flow = jnp.sqrt(jnp.sum((tf[:, None, :] - cf[None, :, :] + _EPS) ** 2, axis=-1))
    post = w_r * jnp.exp(-d_rgb) + w_f * jnp.exp(-d_flow)
    return post / jnp.sum(post, axis=1, keepdims=True)


def _run_case(Q, C, D, seed):
    key = jax.random.PRNGKey(seed)
    k0, k1, k2, k3, k4, k5 = jax.random.split(key, 6)
    x = {
        'context_rgb_features': jax.random.normal(k0, (C, D), jnp.float32),
        'context_flow_features': jax.random.normal(k1, (C, D), jnp.float32),
        'target_rgb_features': jax.random.normal(k2, (Q, D), jnp.float32),
        'target_flow_features': jax.random.normal(k3, (Q, D), jnp.float32),
    }
    output_AAS = {
        'c_r': jax.random.uniform(k4, (Q,), jnp.float32, 0.1, 1.0),
        'c_f': jax.random.uniform(k5, (Q,), jnp.float32, 0.1, 1.0),
    }
    posterior = ami_forward(x, output_AAS)
    jax.block_until_ready(posterior)

    assert posterior.shape == (Q, C)
    row_sums = jnp.sum(posterior, axis=1)
    assert bool(jnp.all(jnp.abs(row_sums - 1.0) < 1e-5))
    ref = _reference(x, output_AAS)
    assert bool(jnp.allclose(posterior, ref, atol=1e-4, rtol=1e-4))


if __name__ == "__main__":
    # Small, deterministic shapes implied by the forward pass:
    #   num_queries Q = 8, num_classes C = 4, feature dim D = 32 (folded path)
    _run_case(Q=8, C=4, D=32, seed=0)
    # D = 128 exercises the non-folded (explicit corr input) path.
    _run_case(Q=8, C=4, D=128, seed=0)
    print("KERNEL_OK")
</pallas_src>

<mosaic_0001>
module attributes {stable_mosaic.version = 11 : i64} {
  func.func @kernel(%arg0: i32, %arg1: memref<8x4xf32, #tpu.memory_space<vmem>>, %arg2: memref<8x128xf32, #tpu.memory_space<vmem>>, %arg3: memref<8x128xf32, #tpu.memory_space<vmem>>, %arg4: memref<128x128xf32, #tpu.memory_space<vmem>>, %arg5: memref<128x128xf32, #tpu.memory_space<vmem>>, %arg6: memref<8x128xf32, #tpu.memory_space<vmem>>) attributes {dimension_semantics = [#tpu.dimension_semantics<parallel>], iteration_bounds = array<i64: 1>, scalar_prefetch = 0 : i64, scratch_operands = 0 : i64, tpu.core_type = #tpu.core_type<tc>, window_params = [{transform_indices = @transform_0, window_bounds = array<i64: 8, 4>}, {transform_indices = @transform_1, window_bounds = array<i64: 8, 128>}, {transform_indices = @transform_2, window_bounds = array<i64: 8, 128>}, {pipeline_mode = #tpu.pipeline_mode<synchronous>, transform_indices = @transform_3, window_bounds = array<i64: 128, 128>}, {pipeline_mode = #tpu.pipeline_mode<synchronous>, transform_indices = @transform_4, window_bounds = array<i64: 128, 128>}, {transform_indices = @transform_5, window_bounds = array<i64: 8, 128>}]} {
    %c0 = arith.constant 0 : index
    %c0_0 = arith.constant 0 : index
    %0 = vector.load %arg1[%c0, %c0_0] : memref<8x4xf32, #tpu.memory_space<vmem>>, vector<8x4xf32>
    %c0_1 = arith.constant 0 : index
    %c0_2 = arith.constant 0 : index
    %1 = vector.load %arg2[%c0_1, %c0_2] : memref<8x128xf32, #tpu.memory_space<vmem>>, vector<8x128xf32>
    %c0_3 = arith.constant 0 : index
    %c0_4 = arith.constant 0 : index
    %2 = vector.load %arg3[%c0_3, %c0_4] : memref<8x128xf32, #tpu.memory_space<vmem>>, vector<8x128xf32>
    %c0_5 = arith.constant 0 : index
    %c0_6 = arith.constant 0 : index
    %3 = vector.load %arg4[%c0_5, %c0_6] : memref<128x128xf32, #tpu.memory_space<vmem>>, vector<128x128xf32>
    %c0_7 = arith.constant 0 : index
    %c0_8 = arith.constant 0 : index
    %4 = vector.load %arg5[%c0_7, %c0_8] : memref<128x128xf32, #tpu.memory_space<vmem>>, vector<128x128xf32>
    %5 = vector.extract_strided_slice %0 {offsets = [0, 0], sizes = [8, 1], strides = [1, 1]} : vector<8x4xf32> to vector<8x1xf32>
    %6 = vector.extract_strided_slice %0 {offsets = [0, 1], sizes = [8, 1], strides = [1, 1]} : vector<8x4xf32> to vector<8x1xf32>
    %7 = vector.extract_strided_slice %0 {offsets = [0, 2], sizes = [8, 1], strides = [1, 1]} : vector<8x4xf32> to vector<8x1xf32>
    %8 = vector.extract_strided_slice %0 {offsets = [0, 3], sizes = [8, 1], strides = [1, 1]} : vector<8x4xf32> to vector<8x1xf32>
    %cst = arith.constant dense<0.000000e+00> : vector<8x128xf32>
    %9 = tpu.matmul %1, %3, %cst {dimension_numbers = #tpu.dot_dimension_numbers<[1], [0], [0], [1], [0, 0, 1, 1], [], []>} : vector<8x128xf32>, vector<128x128xf32>, vector<8x128xf32> -> vector<8x128xf32>
    %cst_9 = arith.constant dense<0.000000e+00> : vector<8x128xf32>
    %10 = tpu.matmul %2, %4, %cst_9 {dimension_numbers = #tpu.dot_dimension_numbers<[1], [0], [0], [1], [0, 0, 1, 1], [], []>} : vector<8x128xf32>, vector<128x128xf32>, vector<8x128xf32> -> vector<8x128xf32>
    %cst_10 = arith.constant 2.000000e+00 : f32
    %11 = vector.broadcast %cst_10 : f32 to vector<8x128xf32>
    %12 = arith.mulf %11, %9 : vector<8x128xf32>
    %13 = vector.broadcast %7 : vector<8x1xf32> to vector<8x128xf32>
    %14 = arith.subf %13, %12 : vector<8x128xf32>
    %cst_11 = arith.constant 2.000000e+00 : f32
    %15 = vector.broadcast %cst_11 : f32 to vector<8x128xf32>
    %16 = arith.mulf %15, %10 : vector<8x128xf32>
    %17 = vector.broadcast %8 : vector<8x1xf32> to vector<8x128xf32>
    %18 = arith.subf %17, %16 : vector<8x128xf32>
    %cst_12 = arith.constant 0.000000e+00 : f32
    %19 = vector.broadcast %cst_12 : f32 to vector<8x128xf32>
    %20 = arith.maximumf %14, %19 : vector<8x128xf32>
    %21 = math.sqrt %20 : vector<8x128xf32>
    %cst_13 = arith.constant 0.000000e+00 : f32
    %22 = vector.broadcast %cst_13 : f32 to vector<8x128xf32>
    %23 = arith.maximumf %18, %22 : vector<8x128xf32>
    %24 = math.sqrt %23 : vector<8x128xf32>
    %25 = vector.broadcast %5 : vector<8x1xf32> to vector<8x128xf32>
    %26 = arith.subf %25, %21 : vector<8x128xf32>
    %27 = math.exp %26 : vector<8x128xf32>
    %28 = vector.broadcast %6 : vector<8x1xf32> to vector<8x128xf32>
    %29 = arith.subf %28, %24 : vector<8x128xf32>
    %30 = math.exp %29 : vector<8x128xf32>
    %31 = arith.addf %27, %30 : vector<8x128xf32>
    %32 = tpu.iota {dimensions = array<i32: 1>} : vector<8x128xi32>
    %c4_i32 = arith.constant 4 : i32
    %33 = vector.broadcast %c4_i32 : i32 to vector<8x128xi32>
    %34 = arith.cmpi slt, %32, %33 : vector<8x128xi32>
    %cst_14 = arith.constant 0.000000e+00 : f32
    %35 = vector.broadcast %cst_14 : f32 to vector<8x128xf32>
    %36 = arith.select %34, %31, %35 : vector<8x128xi1>, vector<8x128xf32>
    %cst_15 = arith.constant dense<0.000000e+00> : vector<8xf32>
    %37 = vector.multi_reduction <add>, %36, %cst_15 [1] : vector<8x128xf32> to vector<8xf32>
    %38 = vector.shape_cast %37 : vector<8xf32> to vector<8x1xf32>
    %cst_16 = arith.constant 1.000000e+00 : f32
    %39 = vector.broadcast %cst_16 : f32 to vector<8x1xf32>
    %40 = arith.divf %39, %38 : vector<8x1xf32>
    %41 = vector.broadcast %40 : vector<8x1xf32> to vector<8x128xf32>
    %42 = arith.mulf %36, %41 : vector<8x128xf32>
    %c0_17 = arith.constant 0 : index
    %c0_18 = arith.constant 0 : index
    %43 = vector.load %arg6[%c0_17, %c0_18] : memref<8x128xf32, #tpu.memory_space<vmem>>, vector<8x128xf32>
    tpu.vector_store %arg6[%c0_17, %c0_18], %42 {strides = array<i32>} : memref<8x128xf32, #tpu.memory_space<vmem>>, vector<8x128xf32>,
    return
  }
  func.func @transform_0(%arg0: i32) -> (i32, i32) {
    %c0_i32 = arith.constant 0 : i32
    %c0_i32_0 = arith.constant 0 : i32
    return %arg0, %c0_i32 : i32, i32
  }
  func.func @transform_1(%arg0: i32) -> (i32, i32) {
    %c0_i32 = arith.constant 0 : i32
    %c0_i32_0 = arith.constant 0 : i32
    return %arg0, %c0_i32 : i32, i32
  }
  func.func @transform_2(%arg0: i32) -> (i32, i32) {
    %c0_i32 = arith.constant 0 : i32
    %c0_i32_0 = arith.constant 0 : i32
    return %arg0, %c0_i32 : i32, i32
  }
  func.func @transform_3(%arg0: i32) -> (i32, i32) {
    %c0_i32 = arith.constant 0 : i32
    %c0_i32_0 = arith.constant 0 : i32
    %c0_i32_1 = arith.constant 0 : i32
    return %c0_i32, %c0_i32_0 : i32, i32
  }
  func.func @transform_4(%arg0: i32) -> (i32, i32) {
    %c0_i32 = arith.constant 0 : i32
    %c0_i32_0 = arith.constant 0 : i32
    %c0_i32_1 = arith.constant 0 : i32
    return %c0_i32, %c0_i32_0 : i32, i32
  }
  func.func @transform_5(%arg0: i32) -> (i32, i32) {
    %c0_i32 = arith.constant 0 : i32
    %c0_i32_0 = arith.constant 0 : i32
    return %arg0, %c0_i32 : i32, i32
  }
}

</mosaic_0001>

<bundles_post_ra>
// kernel: tpu_custom_call.1
= control target key start
LH: loop header
LB: loop body
LE: loop exit
PB: predicated region body
PF: predicated region fallthrough
CT: control target
= control target key end

     0   :  { %10 = vsyncpa [#allocation3], 0  ;;  %s421_s0 = inlined_call_operand.vmem [shape: f32[8,4], index: 0, kind: input, shape index: {}]   ;;  %s422_s1 = inlined_call_operand.vmem [shape: f32[8,128], index: 1, kind: input, shape index: {}]   ;;  %s423_s2 = inlined_call_operand.hbm [shape: f32[8,128], index: 2, kind: input, shape index: {}]   ;;  %s424_s3 = inlined_call_operand.hbm [shape: f32[128,128], index: 3, kind: input, shape index: {}]   ;;  %s425_s4 = inlined_call_operand.hbm [shape: f32[128,128], index: 4, kind: input, shape index: {}]   ;;  %s426_s5 = inlined_call_operand.hbm [shape: f32[8,128], index: 5, kind: output, shape index: {}]  }
   0x1   :  { %11 = vsyncpa [#allocation6], 0  ;;  %s32_s20 = sshll.u32 %s424_s3, 4  ;;  %s33_s20 = int_to_ptr.hbm [resolvable:$true] %s32_s20 }
   0x2   :  { %12 = vsyncpa [#allocation4], 0  ;;  %s363_s21 = smov [#allocation5]   ;;  %s22_s25 = sshll.u32 %s423_s2, 4  ;;  %s23_s25 = int_to_ptr.hbm [resolvable:$true] %s22_s25 }
   0x3   :  { %s34_s22 = sshll.u32 %s363_s21, 4  ;;  %s364_s26 = smov 128   ;;  %s35_s22 = int_to_ptr.vmem [resolvable:$true] %s34_s22 }
   0x4   :  { %s365_s27 = smov 8   ;;  %s366_s28 = smov [#allocation2]  }
   0x5   :  { %40 = dma.hbm_to_vmem [thread:$0]  %s33_s20, 2048, %s35_s22, [#allocation6], %s364_s26, %s364_s26, %s365_s27  }
   0x6   :  { %s24_s29 = sshll.u32 %s366_s28, 4  ;;  %s45_s7 = sshll.u32 %s425_s4, 4  ;;  %s25_s29 = int_to_ptr.vmem [resolvable:$true] %s24_s29  ;;  %s46_s7 = int_to_ptr.hbm [resolvable:$true] %s45_s7 }
   0x7   :  { %27 = dma.hbm_to_vmem [thread:$0]  %s23_s25, 128, %s25_s29, [#allocation3]  }
   0x8   :  { %s367_s3 = smov [#allocation7]  }
   0x9   :  { %s47_s8 = sshll.u32 %s367_s3, 4  ;;  %s48_s8 = int_to_ptr.vmem [resolvable:$true] %s47_s8 }
   0xa   :  { %53 = dma.hbm_to_vmem [thread:$0]  %s46_s7, 2048, %s48_s8, [#allocation6], %s364_s26, %s364_s26, %s365_s27  }
   0xb   :  { %357 = dma.done.wait [#allocation3], 128  }
   0xc   :  { %358 = vsyncadd [#allocation3], 4294967168 }
   0xd   :  { %359 = dma.done.wait [#allocation6], 4096  }
   0xe   :  { %360 = vsyncadd [#allocation6], 4294963200  ;;  %v84_v0 = vld [vmem:[#allocation5 + $0x78] sm:$0xff]  ;;  %v83_v2 = vld [vmem:[#allocation5 + $0x70] sm:$0xff]  ;;  %v368_v6 = vmov 2   ;;  %v369_v7 = vmov 0  }
   0xf   :  { %v100_v1 = vld [vmem:[#allocation7 + $0x78] sm:$0xff]  ;;  %101 = vmatpush.msra.mxu0 %v84_v0  ;;  %v99_v3 = vld [vmem:[#allocation7 + $0x70] sm:$0xff]  ;;  %v82_v4 = vld [vmem:[#allocation5 + $0x68] sm:$0xff]  ;;  %246 = vset.pattern.permute.xlu0 %v368_v6  ;;  %v370_v27 = vmov 3   ;;  %v371_v28 = vmov 1   ;;  %s225_s13 = sshll.u32 %s426_s5, 4  ;;  %s226_s13 = int_to_ptr.hbm [resolvable:$true] %s225_s13 }
  0x10   :  { %121 = vmatpush.msra.mxu1 %v100_v1  ;;  %v98_v5 = vld [vmem:[#allocation7 + $0x68] sm:$0xff]  ;;  %248 = vset.pattern.permute.xlu1 %v369_v7  ;;  %v81_v8 = vld [vmem:[#allocation5 + $0x60] sm:$0xff]  ;;  %v80_v10 = vld [vmem:[#allocation5 + $0x58] sm:$0xff] }
  0x11   :  { %102 = vmatpush.msra.mxu0 %v83_v2  ;;  %v97_v9 = vld [vmem:[#allocation7 + $0x60] sm:$0xff]  ;;  %v96_v11 = vld [vmem:[#allocation7 + $0x58] sm:$0xff]  ;;  %v79_v12 = vld [vmem:[#allocation5 + $0x50] sm:$0xff] }
  0x12   :  { %122 = vmatpush.msra.mxu1 %v99_v3  ;;  %v95_v13 = vld [vmem:[#allocation7 + $0x50] sm:$0xff]  ;;  %v78_v14 = vld [vmem:[#allocation5 + $0x48] sm:$0xff]  ;;  %v66_v16 = vld [vmem:[%s421_s0] sm:$0xff] }
  0x13   :  { %103 = vmatpush.msra.mxu0 %v82_v4  ;;  %v94_v15 = vld [vmem:[#allocation7 + $0x48] sm:$0xff]  ;;  %v77_v17 = vld [vmem:[#allocation5 + $0x40] sm:$0xff]  ;;  %144 = vperm.xlu0 %246, %v66_v16   ;;  %v76_v19 = vld [vmem:[#allocation5 + $0x38] sm:$0xff] }
  0x14   :  { %123 = vmatpush.msra.mxu1 %v98_v5  ;;  %v93_v18 = vld [vmem:[#allocation7 + $0x40] sm:$0xff]  ;;  %181 = vperm.xlu1 %248, %v66_v16   ;;  %v92_v20 = vld [vmem:[#allocation7 + $0x38] sm:$0xff]  ;;  %v75_v21 = vld [vmem:[#allocation5 + $0x30] sm:$0xff] }
  0x15   :  { %104 = vmatpush.msra.mxu0 %v81_v8  ;;  %v91_v22 = vld [vmem:[#allocation7 + $0x30] sm:$0xff]  ;;  %v74_v23 = vld [vmem:[#allocation5 + $0x28] sm:$0xff]  ;;  %v73_v25 = vld [vmem:[#allocation5 + $0x20] sm:$0xff] }
  0x16   :  { %124 = vmatpush.msra.mxu1 %v97_v9  ;;  %v90_v24 = vld [vmem:[#allocation7 + $0x28] sm:$0xff]  ;;  %v89_v26 = vld [vmem:[#allocation7 + $0x20] sm:$0xff]  ;;  %v72_v29 = vld [vmem:[#allocation5 + $0x18] sm:$0xff] }
  0x17   :  { %105 = vmatpush.msra.mxu0 %v80_v10  ;;  %v88_v30 = vld [vmem:[#allocation7 + $0x18] sm:$0xff]  ;;  %v71_v31 = vld [vmem:[#allocation5 + $0x10] sm:$0xff]  ;;  %v70_v33 = vld [vmem:[#allocation5 + $0x8] sm:$0xff] }
  0x18   :  { %125 = vmatpush.msra.mxu1 %v96_v11  ;;  %v87_v32 = vld [vmem:[#allocation7 + $0x10] sm:$0xff]  ;;  %v86_v34 = vld [vmem:[#allocation7 + $0x8] sm:$0xff]  ;;  %v69_v35 = vld [vmem:[#allocation5] sm:$0xff]  ;;  %v195_v11 = vlaneseq }
  0x19   :  { %106 = vmatpush.msra.mxu0 %v79_v12  ;;  %v85_v36 = vld [vmem:[#allocation7] sm:$0xff]  ;;  %v67_v37 = vld [vmem:[%s422_s1] sm:$0xff]  ;;  %s372_s1 = smov [#allocation8]  }
  0x1a   :  { %126 = vmatpush.msra.mxu1 %v95_v13  ;;  %v68_v38 = vld [vmem:[#allocation2] sm:$0xff]  ;;  %v196_v12 = vand.u32 127, %v195_v11  ;;  %s223_s10 = sshll.u32 %s372_s1, 4  ;;  %s224_s10 = int_to_ptr.vmem [resolvable:$true] %s223_s10 }
  0x1b   :  { %107 = vmatpush.msra.mxu0 %v78_v14  ;;  %247 = vset.pattern.permute.xlu0 %v370_v27 }
  0x1c   :  { %127 = vmatpush.msra.mxu1 %v94_v15  ;;  %249 = vset.pattern.permute.xlu1 %v371_v28  ;;  %vm197_vm4 = vcmp.lt.s32.totalorder %v196_v12, 4 }
  0x1d   :  { %108 = vmatpush.msra.mxu0 %v77_v17  ;;  %150 = vperm.xlu0 %247, %v66_v16  }
  0x1e   :  { %128 = vmatpush.msra.mxu1 %v93_v18  ;;  %188 = vperm.xlu1 %249, %v66_v16  }
  0x1f   :  { %109 = vmatpush.msra.mxu0 %v76_v19 }
  0x20   :  { %129 = vmatpush.msra.mxu1 %v92_v20 }
  0x21   :  { %110 = vmatpush.msra.mxu0 %v75_v21 }
  0x22   :  { %130 = vmatpush.msra.mxu1 %v91_v22 }
  0x23   :  { %111 = vmatpush.msra.mxu0 %v74_v23 }
  0x24   :  { %131 = vmatpush.msra.mxu1 %v90_v24 }
  0x25   :  { %112 = vmatpush.msra.mxu0 %v73_v25  ;;  %250 = vset.pattern.permute.xlu0 %v371_v28 }
  0x26   :  { %132 = vmatpush.msra.mxu1 %v89_v26 }
  0x27   :  { %113 = vmatpush.msra.mxu0 %v72_v29 }
  0x28   :  { %133 = vmatpush.msra.mxu1 %v88_v30 }
  0x29   :  { %114 = vmatpush.msra.mxu0 %v71_v31 }
  0x2a   :  { %134 = vmatpush.msra.mxu1 %v87_v32 }
  0x2b   :  { %115 = vmatpush.msra.mxu0 %v70_v33 }
  0x2c   :  { %135 = vmatpush.msra.mxu1 %v86_v34 }
  0x2d   :  { %116 = vmatpush.msra.mxu0 %v69_v35 }
  0x2e   :  { %136 = vmatpush.msra.mxu1 %v85_v36  ;;  %117 = vmatmul.f32.vlgmr.msra.gmra.mxu0 %v67_v37 }
  0x2f   :  { %137 = vmatmul.f32.vlgmr.msra.gmra.mxu1 %v68_v38 }
  0x85   :  { %v145_v39 = vpop.permute.xlu0 %144 }
  0x86   :  { %v182_v52 = vpop.permute.xlu1 %181 }
  0x8f   :  { %v151_v40 = vpop.permute.xlu0 %150 }
  0x90   :  { %v189_v0 = vpop.permute.xlu1 %188 }
  0xab   :  { %v118_v41 = vpop.f32.mrf.mxu0 }
  0xac   :  { %v138_v42 = vpop.f32.mrf.mxu1  ;;  %v141_v43 = vmul.f32 2.0, %v118_v41 }
  0xad   :  { %v148_v44 = vmul.f32 2.0, %v138_v42 }
  0xae   :  { %v147_v45 = vsub.f32 %v145_v39, %v141_v43 }
  0xaf   :  { %v153_v46 = vsub.f32 %v151_v40, %v148_v44 }
  0xb0   :  { %v154_v47 = vmax.f32 %v147_v45, 0.0 }
  0xb1   :  { %v167_v48 = vmax.f32 %v153_v46, 0.0 }
  0xb2   :  { %vm162_vm1 = vcmp.eq.f32.partialorder %v154_v47, inf  ;;  %v165_v2 = vand.u32 2147483648, %v154_v47  ;;  %vm164_vm3 = vcmp.eq.f32.partialorder %v154_v47, 0.0 }
  0xb3   :  { %251 = vrsqrt.f32 %v167_v48  ;;  %vm175_vm0 = vcmp.eq.f32.partialorder %v167_v48, inf  ;;  %v178_v1 = vand.u32 2147483648, %v167_v48  ;;  %vm177_vm2 = vcmp.eq.f32.partialorder %v167_v48, 0.0 }
  0xb4   :  { %253 = vrsqrt.f32 %v154_v47 }
  0xb9   :  { %v252_v49 = vpop.eup %251 }
  0xba   :  { %v254_v50 = vpop.eup %253  ;;  %v169_v51 = vmul.f32 %v252_v49, %v167_v48 }
  0xbb   :  { %v156_v53 = vmul.f32 %v254_v50, %v154_v47 }
  0xbc   :  { %v170_v54 = vmul.f32 %v252_v49, %v169_v51 }
  0xbd   :  { %v157_v55 = vmul.f32 %v254_v50, %v156_v53 }
  0xbe   :  { %v171_v56 = vmul.f32 0.5, %v170_v54 }
  0xbf   :  { %v158_v57 = vmul.f32 0.5, %v157_v55 }
  0xc0   :  { %v172_v58 = vsub.f32 1.5, %v171_v56 }
  0xc1   :  { %v159_v59 = vsub.f32 1.5, %v158_v57 }
  0xc2   :  { %v173_v60 = vmul.f32 %v252_v49, %v172_v58 }
  0xc3   :  { %v160_v61 = vmul.f32 %v254_v50, %v159_v59 }
  0xc4   :  { %v174_v62 = vmul.f32 %v173_v60, %v167_v48 }
  0xc5   :  { %v161_v63 = vmul.f32 %v160_v61, %v154_v47 }
  0xc6   :  { %v176_v3 = vsel %vm175_vm0, %v167_v48, %v174_v62 }
  0xc7   :  { %v163_v4 = vsel %vm162_vm1, %v154_v47, %v161_v63  ;;  %v179_v5 = vsel %vm177_vm2, %v178_v1, %v176_v3 }
  0xc8   :  { %v166_v6 = vsel %vm164_vm3, %v165_v2, %v163_v4  ;;  %v191_v7 = vsub.f32 %v189_v0, %v179_v5 }
  0xc9   :  { %v184_v8 = vsub.f32 %v182_v52, %v166_v6 }
  0xca   :  { %v192_v9 = vmul.f32 1.442695, %v191_v7 }
  0xcb   :  { %v185_v10 = vmul.f32 1.442695, %v184_v8 }
  0xcc   :  { %255 = vpow2.f32 %v192_v9 }
  0xcd   :  { %257 = vpow2.f32 %v185_v10 }
  0xd2   :  { %v256_v13 = vpop.eup %255 }
  0xd3   :  { %v258_v14 = vpop.eup %257 }
  0xd4   :  { %v194_v15 = vadd.f32 %v258_v14, %v256_v13 }
  0xd6   :  { %v198_v16 = vsel %vm197_vm4, %v194_v15, 0.0 }
  0xd7   :  { %199 = vadd.xlane.f32.xlu2 %v198_v16 }
 0x14a   :  { %v200_v17 = vpop.xlane.xlu2 %199 }
 0x14b   :  { %259 = vrcp.f32 %v200_v17  ;;  %v212_v21 = vand.u32 2147483648, %v200_v17  ;;  %v210_v23 = vand.u32 2147483647, %v200_v17  ;;  %vm206_vm6 = vweird.f32 %v200_v17 }
 0x14d   :  { %v213_v25 = vor.u32 1.1754944e-38, %v212_v21  ;;  %vm211_vm8 = vcmp.eq.f32.partialorder %v210_v23, 8.507059e+37 }
 0x151   :  { %v260_v18 = vpop.eup %259 }
 0x152   :  { %v202_v19 = vmul.f32 %v260_v18, %v200_v17  ;;  %vm207_vm5 = vweird.f32 %v260_v18 }
 0x153   :  { %vm208_vm7 = vmor %vm206_vm6, %vm207_vm5 }
 0x154   :  { %v203_v20 = vsub.f32 1.0, %v202_v19 }
 0x156   :  { %v204_v22 = vmul.f32 %v260_v18, %v203_v20 }
 0x158   :  { %v205_v24 = vadd.f32 %v260_v18, %v204_v22 }
 0x15a   :  { %v209_v26 = vsel %vm208_vm7, %v260_v18, %v205_v24 }
 0x15b   :  { %v214_v27 = vsel %vm211_vm8, %v213_v25, %v209_v26 }
 0x15c   :  { %v216_v28 = vmul.f32 %v214_v27, %v198_v16 }
 0x15e   :  { %217 = vst [vmem:[#allocation8] sm:$0xff] %v216_v28 }
 0x15f   :  { %228 = dma.vmem_to_hbm [thread:$0]  %s224_s10, 128, %s226_s13, [#allocation4]  }
 0x160   :  { %361 = dma.done.wait [#allocation4], 128  }
 0x161   :  { %362 = vsyncadd [#allocation4], 4294967168 }
 0x162   :  { %233 = vsyncpa [#allocation3], 1 }
 0x163   :  { %234 = vsyncpa [#allocation6], 1 }
 0x164   :  { %235 = vsyncpa [#allocation4], 1 }

</bundles_post_ra>
